<compile_context>
chip_gen: v7x
topology: tpu7x:2x2x1
jax: 0.10.0
libtpu: 0.0.40
codegen_flags: <defaults>
</compile_context>

<pallas_src>
import jax
import jax.numpy as jnp
import numpy as np
from jax.experimental import pallas as pl
from jax.experimental.pallas import tpu as pltpu

# ---- module geometry (padding=(k-1)/2, padding_mode='zeros' -> length-preserving convs) ----
BATCH = 2
IN_CH = 4
HID_CH = 8
SEQ = 64
KSIZE = 3
PAD = 1
POOL = 2
SEQ1 = SEQ // POOL        # 32
SEQ2 = SEQ1 // POOL       # 16
SEQ3 = SEQ2 // POOL       # 8
CANVAS = BATCH * SEQ      # 128 lanes: batch folded onto the lane axis


def _softplus(x):
    # torch.nn.Softplus(beta=1, threshold=20)
    return jnp.where(x > 20.0, x, jnp.log1p(jnp.exp(jnp.minimum(x, 20.0))))


# --------------------------------- kernel ---------------------------------
def pilati_kernel(x_ref, p_ref, w_ref, b_ref, v_ref, sel_ref, bd_ref, out_ref):
    """x_ref:   (8, 128)      input canvas (Cin rows 0..3, zero rows 4..7; batch in lanes)
       p_ref:   (3, 128, 384) per-layer precomputed [shift(-1) | shift(0) | shift(+1)] maps
                              (layer 0: shift only; layers 1/2: AvgPool(2) fused in)
       w_ref:   (9, 8, 8)     conv tap weights, w_ref[3*l+k] = W_l[:, :, k] (Cin zero-padded)
       b_ref:   (3, 8, 1)     conv biases
       v_ref:   (8, 128)      dense weight with the 3rd AvgPool folded in (stage-2 canvas)
       sel_ref: (128, 128)    tail selector: column b sums lanes [b*16, (b+1)*16)
       bd_ref:  (1, 1)        dense bias
       out_ref: (1, 128)      columns 0..BATCH-1 hold the result."""
    f32 = jnp.float32

    def layer(act, l):
        # One wide matmul builds all three shifted (and pooled) copies side by side.
        shifted = jnp.dot(act, p_ref[l], preferred_element_type=f32)          # (8, 384)
        y = b_ref[l]                                                          # (8, 1)
        for k in range(KSIZE):                                                # static unroll
            y = y + jnp.dot(w_ref[KSIZE * l + k],
                            shifted[:, k * CANVAS:(k + 1) * CANVAS],
                            preferred_element_type=f32)                       # (8, 128)
        return _softplus(y)

    act = x_ref[...]                # (8, 128), valid lanes [0, 128), per-batch length 64
    act = layer(act, 0)             # valid lanes [0, 128)
    act = layer(act, 1)             # valid lanes [0, 64)
    act = layer(act, 2)             # valid lanes [0, 32)

    # Final AvgPool + Flatten + Linear: pool & dense weight are folded into v, so only an
    # elementwise multiply, a sublane reduce and one small selector matmul remain.
    s = jnp.sum(act * v_ref[...], axis=0, keepdims=True)                      # (1, 128)
    out_ref[...] = jnp.dot(s, sel_ref[...], preferred_element_type=f32) + bd_ref[...]


# ----------------------- host-side packing (runs ONCE, outside jit) -----------------------
def pack_params(params):
    w1, b1, w2, b2, w3, b3, wd_flat, bd = [np.asarray(p, np.float32) for p in params]

    # Conv weights, one (8, 8) slab per (layer, tap); layer-1 Cin=4 zero-padded to 8.
    def taps(w):
        cout, cin, _ = w.shape
        out = np.zeros((KSIZE, HID_CH, HID_CH), np.float32)
        for k in range(KSIZE):
            out[k, :cout, :cin] = w[:, :, k]
        return out

    w_taps = np.concatenate([taps(w1), taps(w2), taps(w3)], axis=0)            # (9, 8, 8)
    b_all = np.stack([b1, b2, b3]).reshape(3, HID_CH, 1)                       # (3, 8, 1)

    # Precomputed shift / pool+shift matrices: m_d[r, c] routes input-canvas lane r to
    # output-canvas lane c for conv tap delta=d, with per-batch zero padding ('zeros' mode).
    def pool_shift(l_in, pool):
        l_out = l_in // pool
        r = np.arange(CANVAS)[:, None]
        c = np.arange(CANVAS)[None, :]
        same = (r // l_in == c // l_out) & (r // l_in < BATCH) & (c // l_out < BATCH)
        pos_in = (r % l_in) // pool
        pos_out = c % l_out
        mats = [np.where(same & (pos_in == pos_out + d), 1.0 / pool, 0.0)
                for d in (-1, 0, 1)]
        return np.concatenate(mats, axis=1).astype(np.float32)                 # (128, 384)

    p_all = np.stack([pool_shift(SEQ, 1),        # layer 1: shift only (no preceding pool)
                      pool_shift(SEQ, POOL),     # layer 2: AvgPool(2) of act1 + shift
                      pool_shift(SEQ1, POOL)])   # layer 3: AvgPool(2) of act2 + shift

    # Dense weight with the 3rd AvgPool folded in, laid out on the stage-2 canvas:
    #   v[c, SEQ2*b + POOL*t + r] = wd[c, t] / POOL   (matches nn.Flatten channel-major order)
    wd = wd_flat.reshape(HID_CH, SEQ3)
    v = np.repeat(wd, POOL, axis=1) / POOL                                     # (8, 16)
    v = np.tile(v, (1, BATCH))                                                 # (8, 32)
    v = np.pad(v, ((0, 0), (0, CANVAS - BATCH * SEQ2)))                        # (8, 128)

    # Tail selector: column b sums the 16 lanes of batch b.
    r = np.arange(CANVAS)[:, None]
    c = np.arange(CANVAS)[None, :]
    sel = ((c < BATCH) & (r // SEQ2 == c)).astype(np.float32)                  # (128, 128)

    return (jnp.asarray(p_all), jnp.asarray(w_taps), jnp.asarray(b_all),
            jnp.asarray(v), jnp.asarray(sel), jnp.asarray(bd.reshape(1, 1)))


# --------------------------------- forward ---------------------------------
@jax.jit
def pilati_forward(x, packed):
    """x: (B, IN_CH, SEQ) float32 (NCL, like PyTorch). packed: output of pack_params.
    Returns (B, 1) float32."""
    p_all, w_taps, b_all, v, sel, bd = packed
    xc = jnp.transpose(x, (1, 0, 2)).reshape(IN_CH, CANVAS)                    # batch -> lanes
    xc = jnp.pad(xc, ((0, HID_CH - IN_CH), (0, 0)))                            # (8, 128)

    out = pl.pallas_call(
        pilati_kernel,
        out_shape=jax.ShapeDtypeStruct((1, CANVAS), jnp.float32),
        in_specs=[pl.BlockSpec(memory_space=pltpu.MemorySpace.VMEM)] * 7,
        out_specs=pl.BlockSpec(memory_space=pltpu.MemorySpace.VMEM),
        cost_estimate=pl.CostEstimate(        # tiny kernel: let XLA overlap neighbours
            flops=2_700_000, transcendentals=3_072, bytes_accessed=750_000),
    )(xc, p_all, w_taps, b_all, v, sel, bd)
    return out[0, :BATCH].reshape(BATCH, 1)


# ---------------- pure-JAX reference (correctness check only) ----------------
def ref_forward(x, params):
    w1, b1, w2, b2, w3, b3, wd_flat, bd = params

    def layer(h, w, b):
        y = jax.lax.conv_general_dilated(
            h, w, window_strides=(1,), padding=[(PAD, PAD)],
            dimension_numbers=("NCH", "OIH", "NCH"))
        y = _softplus(y + b[None, :, None])
        n, c, l = y.shape
        return y.reshape(n, c, l // POOL, POOL).mean(axis=-1)

    h = layer(x, w1, b1)
    h = layer(h, w2, b2)
    h = layer(h, w3, b3)
    flat = h.reshape(h.shape[0], -1)
    return flat @ wd_flat[:, None] + bd


def make_params(key):
    ks = jax.random.split(key, 8)

    def unif(k, shape, fan_in):
        bound = 1.0 / np.sqrt(fan_in)
        return jax.random.uniform(k, shape, jnp.float32, -bound, bound)

    w1 = unif(ks[0], (HID_CH, IN_CH, KSIZE), IN_CH * KSIZE)
    b1 = unif(ks[1], (HID_CH,), IN_CH * KSIZE)
    w2 = unif(ks[2], (HID_CH, HID_CH, KSIZE), HID_CH * KSIZE)
    b2 = unif(ks[3], (HID_CH,), HID_CH * KSIZE)
    w3 = unif(ks[4], (HID_CH, HID_CH, KSIZE), HID_CH * KSIZE)
    b3 = unif(ks[5], (HID_CH,), HID_CH * KSIZE)
    wd_flat = unif(ks[6], (HID_CH * SEQ3,), HID_CH * SEQ3)
    bd = unif(ks[7], (1,), HID_CH * SEQ3)
    return (w1, b1, w2, b2, w3, b3, wd_flat, bd)


if __name__ == "__main__":
    key = jax.random.PRNGKey(0)
    pkey, xkey = jax.random.split(key)
    params = make_params(pkey)
    x = jax.random.normal(xkey, (BATCH, IN_CH, SEQ), jnp.float32)

    packed = pack_params(params)   # hoisted: packing runs once, not per forward call

    out = jax.block_until_ready(pilati_forward(x, packed))
    ref = jax.block_until_ready(ref_forward(x, params))

    assert out.shape == (BATCH, 1)
    assert np.allclose(np.asarray(out), np.asarray(ref), rtol=1e-4, atol=1e-4), (
        f"mismatch: pallas={np.asarray(out)} ref={np.asarray(ref)}")

    print("KERNEL_OK")
</pallas_src>

<mosaic_0001>
module attributes {stable_mosaic.version = 11 : i64} {
  func.func @pilati_kernel(%arg0: memref<8x128xf32, #tpu.memory_space<vmem>>, %arg1: memref<3x128x384xf32, #tpu.memory_space<vmem>>, %arg2: memref<9x8x8xf32, #tpu.memory_space<vmem>>, %arg3: memref<3x8x1xf32, #tpu.memory_space<vmem>>, %arg4: memref<8x128xf32, #tpu.memory_space<vmem>>, %arg5: memref<128x128xf32, #tpu.memory_space<vmem>>, %arg6: memref<1x1xf32, #tpu.memory_space<vmem>>, %arg7: memref<1x128xf32, #tpu.memory_space<vmem>>) attributes {dimension_semantics = [], scalar_prefetch = 0 : i64, scratch_operands = 0 : i64, tpu.core_type = #tpu.core_type<tc>} {
    %c0 = arith.constant 0 : index
    %c0_0 = arith.constant 0 : index
    %0 = vector.load %arg0[%c0, %c0_0] : memref<8x128xf32, #tpu.memory_space<vmem>>, vector<8x128xf32>
    %c0_1 = arith.constant 0 : index
    %c0_2 = arith.constant 0 : index
    %c0_3 = arith.constant 0 : index
    %1 = vector.load %arg1[%c0_1, %c0_2, %c0_3] : memref<3x128x384xf32, #tpu.memory_space<vmem>>, vector<1x128x384xf32>
    %2 = vector.shape_cast %1 : vector<1x128x384xf32> to vector<128x384xf32>
    %cst = arith.constant dense<0.000000e+00> : vector<8x384xf32>
    %3 = tpu.matmul %0, %2, %cst {dimension_numbers = #tpu.dot_dimension_numbers<[1], [0], [0], [1], [0, 0, 1, 1], [], []>} : vector<8x128xf32>, vector<128x384xf32>, vector<8x384xf32> -> vector<8x384xf32>
    %c0_4 = arith.constant 0 : index
    %c0_5 = arith.constant 0 : index
    %c0_6 = arith.constant 0 : index
    %4 = vector.load %arg3[%c0_4, %c0_5, %c0_6] : memref<3x8x1xf32, #tpu.memory_space<vmem>>, vector<1x8x1xf32>
    %5 = vector.shape_cast %4 : vector<1x8x1xf32> to vector<8x1xf32>
    %c0_7 = arith.constant 0 : index
    %c0_8 = arith.constant 0 : index
    %c0_9 = arith.constant 0 : index
    %6 = vector.load %arg2[%c0_7, %c0_8, %c0_9] : memref<9x8x8xf32, #tpu.memory_space<vmem>>, vector<1x8x8xf32>
    %7 = vector.shape_cast %6 : vector<1x8x8xf32> to vector<8x8xf32>
    %8 = vector.extract_strided_slice %3 {offsets = [0, 0], sizes = [8, 128], strides = [1, 1]} : vector<8x384xf32> to vector<8x128xf32>
    %cst_10 = arith.constant dense<0.000000e+00> : vector<8x128xf32>
    %9 = tpu.matmul %7, %8, %cst_10 {dimension_numbers = #tpu.dot_dimension_numbers<[1], [0], [0], [1], [0, 0, 1, 1], [], []>} : vector<8x8xf32>, vector<8x128xf32>, vector<8x128xf32> -> vector<8x128xf32>
    %10 = vector.broadcast %5 : vector<8x1xf32> to vector<8x128xf32>
    %11 = arith.addf %10, %9 : vector<8x128xf32>
    %c1 = arith.constant 1 : index
    %c0_11 = arith.constant 0 : index
    %c0_12 = arith.constant 0 : index
    %12 = vector.load %arg2[%c1, %c0_11, %c0_12] : memref<9x8x8xf32, #tpu.memory_space<vmem>>, vector<1x8x8xf32>
    %13 = vector.shape_cast %12 : vector<1x8x8xf32> to vector<8x8xf32>
    %14 = vector.extract_strided_slice %3 {offsets = [0, 128], sizes = [8, 128], strides = [1, 1]} : vector<8x384xf32> to vector<8x128xf32>
    %cst_13 = arith.constant dense<0.000000e+00> : vector<8x128xf32>
    %15 = tpu.matmul %13, %14, %cst_13 {dimension_numbers = #tpu.dot_dimension_numbers<[1], [0], [0], [1], [0, 0, 1, 1], [], []>} : vector<8x8xf32>, vector<8x128xf32>, vector<8x128xf32> -> vector<8x128xf32>
    %16 = arith.addf %11, %15 : vector<8x128xf32>
    %c2 = arith.constant 2 : index
    %c0_14 = arith.constant 0 : index
    %c0_15 = arith.constant 0 : index
    %17 = vector.load %arg2[%c2, %c0_14, %c0_15] : memref<9x8x8xf32, #tpu.memory_space<vmem>>, vector<1x8x8xf32>
    %18 = vector.shape_cast %17 : vector<1x8x8xf32> to vector<8x8xf32>
    %19 = vector.extract_strided_slice %3 {offsets = [0, 256], sizes = [8, 128], strides = [1, 1]} : vector<8x384xf32> to vector<8x128xf32>
    %cst_16 = arith.constant dense<0.000000e+00> : vector<8x128xf32>
    %20 = tpu.matmul %18, %19, %cst_16 {dimension_numbers = #tpu.dot_dimension_numbers<[1], [0], [0], [1], [0, 0, 1, 1], [], []>} : vector<8x8xf32>, vector<8x128xf32>, vector<8x128xf32> -> vector<8x128xf32>
    %21 = arith.addf %16, %20 : vector<8x128xf32>
    %cst_17 = arith.constant 2.000000e+01 : f32
    %22 = vector.broadcast %cst_17 : f32 to vector<8x128xf32>
    %23 = arith.cmpf ogt, %21, %22 : vector<8x128xf32>
    %cst_18 = arith.constant 2.000000e+01 : f32
    %24 = vector.broadcast %cst_18 : f32 to vector<8x128xf32>
    %25 = arith.minimumf %21, %24 : vector<8x128xf32>
    %26 = math.exp %25 : vector<8x128xf32>
    %27 = math.log1p %26 : vector<8x128xf32>
    %28 = arith.select %23, %21, %27 : vector<8x128xi1>, vector<8x128xf32>
    %c1_19 = arith.constant 1 : index
    %c0_20 = arith.constant 0 : index
    %c0_21 = arith.constant 0 : index
    %29 = vector.load %arg1[%c1_19, %c0_20, %c0_21] : memref<3x128x384xf32, #tpu.memory_space<vmem>>, vector<1x128x384xf32>
    %30 = vector.shape_cast %29 : vector<1x128x384xf32> to vector<128x384xf32>
    %cst_22 = arith.constant dense<0.000000e+00> : vector<8x384xf32>
    %31 = tpu.matmul %28, %30, %cst_22 {dimension_numbers = #tpu.dot_dimension_numbers<[1], [0], [0], [1], [0, 0, 1, 1], [], []>} : vector<8x128xf32>, vector<128x384xf32>, vector<8x384xf32> -> vector<8x384xf32>
    %c1_23 = arith.constant 1 : index
    %c0_24 = arith.constant 0 : index
    %c0_25 = arith.constant 0 : index
    %32 = vector.load %arg3[%c1_23, %c0_24, %c0_25] : memref<3x8x1xf32, #tpu.memory_space<vmem>>, vector<1x8x1xf32>
    %33 = vector.shape_cast %32 : vector<1x8x1xf32> to vector<8x1xf32>
    %c3 = arith.constant 3 : index
    %c0_26 = arith.constant 0 : index
    %c0_27 = arith.constant 0 : index
    %34 = vector.load %arg2[%c3, %c0_26, %c0_27] : memref<9x8x8xf32, #tpu.memory_space<vmem>>, vector<1x8x8xf32>
    %35 = vector.shape_cast %34 : vector<1x8x8xf32> to vector<8x8xf32>
    %36 = vector.extract_strided_slice %31 {offsets = [0, 0], sizes = [8, 128], strides = [1, 1]} : vector<8x384xf32> to vector<8x128xf32>
    %cst_28 = arith.constant dense<0.000000e+00> : vector<8x128xf32>
    %37 = tpu.matmul %35, %36, %cst_28 {dimension_numbers = #tpu.dot_dimension_numbers<[1], [0], [0], [1], [0, 0, 1, 1], [], []>} : vector<8x8xf32>, vector<8x128xf32>, vector<8x128xf32> -> vector<8x128xf32>
    %38 = vector.broadcast %33 : vector<8x1xf32> to vector<8x128xf32>
    %39 = arith.addf %38, %37 : vector<8x128xf32>
    %c4 = arith.constant 4 : index
    %c0_29 = arith.constant 0 : index
    %c0_30 = arith.constant 0 : index
    %40 = vector.load %arg2[%c4, %c0_29, %c0_30] : memref<9x8x8xf32, #tpu.memory_space<vmem>>, vector<1x8x8xf32>
    %41 = vector.shape_cast %40 : vector<1x8x8xf32> to vector<8x8xf32>
    %42 = vector.extract_strided_slice %31 {offsets = [0, 128], sizes = [8, 128], strides = [1, 1]} : vector<8x384xf32> to vector<8x128xf32>
    %cst_31 = arith.constant dense<0.000000e+00> : vector<8x128xf32>
    %43 = tpu.matmul %41, %42, %cst_31 {dimension_numbers = #tpu.dot_dimension_numbers<[1], [0], [0], [1], [0, 0, 1, 1], [], []>} : vector<8x8xf32>, vector<8x128xf32>, vector<8x128xf32> -> vector<8x128xf32>
    %44 = arith.addf %39, %43 : vector<8x128xf32>
    %c5 = arith.constant 5 : index
    %c0_32 = arith.constant 0 : index
    %c0_33 = arith.constant 0 : index
    %45 = vector.load %arg2[%c5, %c0_32, %c0_33] : memref<9x8x8xf32, #tpu.memory_space<vmem>>, vector<1x8x8xf32>
    %46 = vector.shape_cast %45 : vector<1x8x8xf32> to vector<8x8xf32>
    %47 = vector.extract_strided_slice %31 {offsets = [0, 256], sizes = [8, 128], strides = [1, 1]} : vector<8x384xf32> to vector<8x128xf32>
    %cst_34 = arith.constant dense<0.000000e+00> : vector<8x128xf32>
    %48 = tpu.matmul %46, %47, %cst_34 {dimension_numbers = #tpu.dot_dimension_numbers<[1], [0], [0], [1], [0, 0, 1, 1], [], []>} : vector<8x8xf32>, vector<8x128xf32>, vector<8x128xf32> -> vector<8x128xf32>
    %49 = arith.addf %44, %48 : vector<8x128xf32>
    %cst_35 = arith.constant 2.000000e+01 : f32
    %50 = vector.broadcast %cst_35 : f32 to vector<8x128xf32>
    %51 = arith.cmpf ogt, %49, %50 : vector<8x128xf32>
    %cst_36 = arith.constant 2.000000e+01 : f32
    %52 = vector.broadcast %cst_36 : f32 to vector<8x128xf32>
    %53 = arith.minimumf %49, %52 : vector<8x128xf32>
    %54 = math.exp %53 : vector<8x128xf32>
    %55 = math.log1p %54 : vector<8x128xf32>
    %56 = arith.select %51, %49, %55 : vector<8x128xi1>, vector<8x128xf32>
    %c2_37 = arith.constant 2 : index
    %c0_38 = arith.constant 0 : index
    %c0_39 = arith.constant 0 : index
    %57 = vector.load %arg1[%c2_37, %c0_38, %c0_39] : memref<3x128x384xf32, #tpu.memory_space<vmem>>, vector<1x128x384xf32>
    %58 = vector.shape_cast %57 : vector<1x128x384xf32> to vector<128x384xf32>
    %cst_40 = arith.constant dense<0.000000e+00> : vector<8x384xf32>
    %59 = tpu.matmul %56, %58, %cst_40 {dimension_numbers = #tpu.dot_dimension_numbers<[1], [0], [0], [1], [0, 0, 1, 1], [], []>} : vector<8x128xf32>, vector<128x384xf32>, vector<8x384xf32> -> vector<8x384xf32>
    %c2_41 = arith.constant 2 : index
    %c0_42 = arith.constant 0 : index
    %c0_43 = arith.constant 0 : index
    %60 = vector.load %arg3[%c2_41, %c0_42, %c0_43] : memref<3x8x1xf32, #tpu.memory_space<vmem>>, vector<1x8x1xf32>
    %61 = vector.shape_cast %60 : vector<1x8x1xf32> to vector<8x1xf32>
    %c6 = arith.constant 6 : index
    %c0_44 = arith.constant 0 : index
    %c0_45 = arith.constant 0 : index
    %62 = vector.load %arg2[%c6, %c0_44, %c0_45] : memref<9x8x8xf32, #tpu.memory_space<vmem>>, vector<1x8x8xf32>
    %63 = vector.shape_cast %62 : vector<1x8x8xf32> to vector<8x8xf32>
    %64 = vector.extract_strided_slice %59 {offsets = [0, 0], sizes = [8, 128], strides = [1, 1]} : vector<8x384xf32> to vector<8x128xf32>
    %cst_46 = arith.constant dense<0.000000e+00> : vector<8x128xf32>
    %65 = tpu.matmul %63, %64, %cst_46 {dimension_numbers = #tpu.dot_dimension_numbers<[1], [0], [0], [1], [0, 0, 1, 1], [], []>} : vector<8x8xf32>, vector<8x128xf32>, vector<8x128xf32> -> vector<8x128xf32>
    %66 = vector.broadcast %61 : vector<8x1xf32> to vector<8x128xf32>
    %67 = arith.addf %66, %65 : vector<8x128xf32>
    %c7 = arith.constant 7 : index
    %c0_47 = arith.constant 0 : index
    %c0_48 = arith.constant 0 : index
    %68 = vector.load %arg2[%c7, %c0_47, %c0_48] : memref<9x8x8xf32, #tpu.memory_space<vmem>>, vector<1x8x8xf32>
    %69 = vector.shape_cast %68 : vector<1x8x8xf32> to vector<8x8xf32>
    %70 = vector.extract_strided_slice %59 {offsets = [0, 128], sizes = [8, 128], strides = [1, 1]} : vector<8x384xf32> to vector<8x128xf32>
    %cst_49 = arith.constant dense<0.000000e+00> : vector<8x128xf32>
    %71 = tpu.matmul %69, %70, %cst_49 {dimension_numbers = #tpu.dot_dimension_numbers<[1], [0], [0], [1], [0, 0, 1, 1], [], []>} : vector<8x8xf32>, vector<8x128xf32>, vector<8x128xf32> -> vector<8x128xf32>
    %72 = arith.addf %67, %71 : vector<8x128xf32>
    %c8 = arith.constant 8 : index
    %c0_50 = arith.constant 0 : index
    %c0_51 = arith.constant 0 : index
    %73 = vector.load %arg2[%c8, %c0_50, %c0_51] : memref<9x8x8xf32, #tpu.memory_space<vmem>>, vector<1x8x8xf32>
    %74 = vector.shape_cast %73 : vector<1x8x8xf32> to vector<8x8xf32>
    %75 = vector.extract_strided_slice %59 {offsets = [0, 256], sizes = [8, 128], strides = [1, 1]} : vector<8x384xf32> to vector<8x128xf32>
    %cst_52 = arith.constant dense<0.000000e+00> : vector<8x128xf32>
    %76 = tpu.matmul %74, %75, %cst_52 {dimension_numbers = #tpu.dot_dimension_numbers<[1], [0], [0], [1], [0, 0, 1, 1], [], []>} : vector<8x8xf32>, vector<8x128xf32>, vector<8x128xf32> -> vector<8x128xf32>
    %77 = arith.addf %72, %76 : vector<8x128xf32>
    %cst_53 = arith.constant 2.000000e+01 : f32
    %78 = vector.broadcast %cst_53 : f32 to vector<8x128xf32>
    %79 = arith.cmpf ogt, %77, %78 : vector<8x128xf32>
    %cst_54 = arith.constant 2.000000e+01 : f32
    %80 = vector.broadcast %cst_54 : f32 to vector<8x128xf32>
    %81 = arith.minimumf %77, %80 : vector<8x128xf32>
    %82 = math.exp %81 : vector<8x128xf32>
    %83 = math.log1p %82 : vector<8x128xf32>
    %84 = arith.select %79, %77, %83 : vector<8x128xi1>, vector<8x128xf32>
    %c0_55 = arith.constant 0 : index
    %c0_56 = arith.constant 0 : index
    %85 = vector.load %arg4[%c0_55, %c0_56] : memref<8x128xf32, #tpu.memory_space<vmem>>, vector<8x128xf32>
    %86 = arith.mulf %84, %85 : vector<8x128xf32>
    %cst_57 = arith.constant dense<0.000000e+00> : vector<128xf32>
    %87 = vector.multi_reduction <add>, %86, %cst_57 [0] : vector<8x128xf32> to vector<128xf32>
    %88 = vector.shape_cast %87 : vector<128xf32> to vector<1x128xf32>
    %c0_58 = arith.constant 0 : index
    %c0_59 = arith.constant 0 : index
    %89 = vector.load %arg5[%c0_58, %c0_59] : memref<128x128xf32, #tpu.memory_space<vmem>>, vector<128x128xf32>
    %cst_60 = arith.constant dense<0.000000e+00> : vector<1x128xf32>
    %90 = tpu.matmul %88, %89, %cst_60 {dimension_numbers = #tpu.dot_dimension_numbers<[1], [0], [0], [1], [0, 0, 1, 1], [], []>} : vector<1x128xf32>, vector<128x128xf32>, vector<1x128xf32> -> vector<1x128xf32>
    %c0_61 = arith.constant 0 : index
    %c0_62 = arith.constant 0 : index
    %91 = vector.load %arg6[%c0_61, %c0_62] : memref<1x1xf32, #tpu.memory_space<vmem>>, vector<1x1xf32>
    %92 = vector.broadcast %91 : vector<1x1xf32> to vector<1x128xf32>
    %93 = arith.addf %90, %92 : vector<1x128xf32>
    %c0_63 = arith.constant 0 : index
    %c0_64 = arith.constant 0 : index
    %94 = vector.load %arg7[%c0_63, %c0_64] : memref<1x128xf32, #tpu.memory_space<vmem>>, vector<1x128xf32>
    tpu.vector_store %arg7[%c0_63, %c0_64], %93 {strides = array<i32>} : memref<1x128xf32, #tpu.memory_space<vmem>>, vector<1x128xf32>,
    return
  }
}

</mosaic_0001>

<bundles_post_ra>
// kernel: pilati_forward.1
= control target key start
LH: loop header
LB: loop body
LE: loop exit
PB: predicated region body
PF: predicated region fallthrough
CT: control target
= control target key end

     0   :  { %s2243_s0 = inlined_call_operand.vmem [shape: f32[8,128], index: 0, kind: input, shape index: {}]   ;;  %s2244_s1 = inlined_call_operand.hbm [shape: f32[3,128,384], index: 1, kind: input, shape index: {}]   ;;  %s2245_s2 = inlined_call_operand.vmem [shape: f32[9,8,8], index: 2, kind: input, shape index: {}]   ;;  %s2246_s3 = inlined_call_operand.vmem [shape: f32[3,8,1], index: 3, kind: input, shape index: {}]   ;;  %s2247_s4 = inlined_call_operand.vmem [shape: f32[8,128], index: 4, kind: input, shape index: {}]   ;;  %s2248_s5 = inlined_call_operand.vmem [shape: f32[128,128], index: 5, kind: input, shape index: {}]   ;;  %s2249_s6 = inlined_call_operand.<no memory space> [shape: f32[1,1], index: 6, kind: input, shape index: {}]   ;;  %s2250_s7 = inlined_call_operand.vmem [shape: f32[1,128], index: 7, kind: output, shape index: {}]  }
   0x1   :  { %v12_v0 = vstv %s2249_s6 }
   0x2   :  { %13 = vst [vmem:[#allocation2] sm:$0x1] %v12_v0 }
   0x3   :  { %14 = vsyncpa [#allocation4], 0  ;;  %s2009_s26 = smov [#allocation3]   ;;  %s1985_s30 = scalar_lea.hbm %s2244_s1, 18432 }
   0x4   :  { %s22_s27 = sshll.u32 %s2009_s26, 4  ;;  %p1986_p0 = scmp.ne.s32.totalorder %s2244_s1, %s1985_s30  ;;  %s23_s27 = int_to_ptr.vmem [resolvable:$true] %s22_s27 }
   0x5   :  { %p1989_p1 = scmp.lt.u32.totalorder %s1985_s30, %s2244_s1 }
   0x7   :  { %p1991_p2 = pnand %p1989_p1, %p1986_p0 }
   0x9   :  { %1994 = shalt.err (!%p1991_p2)
}
   0xa   :  { %s1995_s6 = scalar_lea.vmem %s23_s27, 18432  ;;  %p2000_p4 = scmp.lt.s32.totalorder %s23_s27, %s23_s27 }
   0xb   :  { %p1996_p3 = scmp.ne.s32.totalorder %s23_s27, %s1995_s6  ;;  %p2001_p5 = scmp.lt.s32.totalorder %s1995_s6, %s1995_s6 }
   0xd   :  { %p2002_p6 = por %p2001_p5, %p2000_p4 }
   0xf   :  { %p2003_p7 = pnand %p2002_p6, %p1996_p3 }
  0x11   :  { %2006 = shalt.err (!%p2003_p7)
}
  0x12   :  { %s2010_s12 = smov 384   ;;  %s2011_s13 = smov 24  }
  0x13   :  { %28 = dma.hbm_to_vmem [thread:$0]  %s2244_s1, 18432, %s23_s27, [#allocation4], %s2010_s12, %s2010_s12, %s2011_s13  }
  0x14   :  { %2007 = dma.done.wait [#allocation4], 18432  }
  0x15   :  { %2008 = vsyncadd [#allocation4], 4294948864  ;;  %v2012_v1 = vmov 0.0|0.0   ;;  %v2013_v2 = vmov 0.0   ;;  %vm2014_vm0 = vmmov 0   ;;  %v44_v3 = vld [vmem:[#allocation3 + $0x8] sm:$0xff] }
  0x16   :  { %1790 = vmatprep.subr.bf16.mxu1 %v2012_v1  ;;  %155 = vmatprep.mubr.f32.mxu0 %v2013_v2  ;;  %v47_v4 = vld [vmem:[#allocation3 + $0x20] sm:$0xff]  ;;  %v46_v7 = vld [vmem:[#allocation3 + $0x18] sm:$0xff]  ;;  %v53_v9 = vld [vmem:[#allocation3 + $0x50] sm:$0xff]  ;;  %vm234_vm1 = vcmask 64512  }
  0x17   :  { %1605 = vmatprep.mubr.msk.f32.mxu1 %vm2014_vm0, %v2013_v2  ;;  %v43_v5 = vld [vmem:[#allocation3] sm:$0xff]  ;;  %v1758_v6 = vpack.c.bf16 %v47_v4, %v44_v3  ;;  %v50_v8 = vld [vmem:[#allocation3 + $0x38] sm:$0xff]  ;;  %v49_v12 = vld [vmem:[#allocation3 + $0x30] sm:$0xff] }
  0x18   :  { %v1760_v10 = vpack.c.bf16 %v46_v7, %v43_v5  ;;  %v1762_v11 = vpack.c.bf16 %v53_v9, %v50_v8  ;;  %v52_v13 = vld [vmem:[#allocation3 + $0x48] sm:$0xff]  ;;  %v59_v15 = vld [vmem:[#allocation3 + $0x80] sm:$0xff]  ;;  %v45_v17 = vld [vmem:[#allocation3 + $0x10] sm:$0xff] }
  0x19   :  { %v56_v14 = vld [vmem:[#allocation3 + $0x68] sm:$0xff]  ;;  %1759 = vmatprep.subr.bf16.mxu0 %v1758_v6  ;;  %v1764_v16 = vpack.c.bf16 %v52_v13, %v49_v12  ;;  %v55_v19 = vld [vmem:[#allocation3 + $0x60] sm:$0xff]  ;;  %v58_v20 = vld [vmem:[#allocation3 + $0x78] sm:$0xff] }
  0x1a   :  { %1761 = vmatpush1.bf16.msra.mxu0 %v1760_v10  ;;  %v1766_v18 = vpack.c.bf16 %v59_v15, %v56_v14  ;;  %v48_v21 = vld [vmem:[#allocation3 + $0x28] sm:$0xff]  ;;  %v62_v22 = vld [vmem:[#allocation3 + $0x98] sm:$0xff]  ;;  %v65_v23 = vld [vmem:[#allocation3 + $0xb0] sm:$0xff]  ;;  %v1768_v27 = vpack.c.bf16 %v58_v20, %v55_v19  ;;  %v2015_v15 = vmov 0  }
  0x1b   :  { %1763 = vmatprep.subr.bf16.mxu0 %v1762_v11  ;;  %v1791_v24 = vpack.c.bf16 %v48_v21, %v45_v17  ;;  %v51_v25 = vld [vmem:[#allocation3 + $0x40] sm:$0xff]  ;;  %v54_v26 = vld [vmem:[#allocation3 + $0x58] sm:$0xff]  ;;  %v61_v28 = vld [vmem:[#allocation3 + $0x90] sm:$0xff]  ;;  %v1770_v30 = vpack.c.bf16 %v65_v23, %v62_v22  ;;  %1971 = vset.pattern.permute.xlu0 %v2015_v15 }
  0x1c   :  { %v1794_v29 = vpack.c.bf16 %v54_v26, %v51_v25  ;;  %v64_v31 = vld [vmem:[#allocation3 + $0xa8] sm:$0xff]  ;;  %v57_v32 = vld [vmem:[#allocation3 + $0x70] sm:$0xff]  ;;  %v71_v35 = vld [vmem:[#allocation3 + $0xe0] sm:$0xff]  ;;  %1972 = vset.pattern.permute.xlu1 %v2015_v15 }
  0x1d   :  { %1792 = vmatpush3.bf16.msra.mxu1 %v1791_v24  ;;  %v60_v33 = vld [vmem:[#allocation3 + $0x88] sm:$0xff]  ;;  %v1772_v36 = vpack.c.bf16 %v64_v31, %v61_v28  ;;  %v67_v37 = vld [vmem:[#allocation3 + $0xc0] sm:$0xff]  ;;  %v70_v40 = vld [vmem:[#allocation3 + $0xd8] sm:$0xff] }
  0x1e   :  { %1765 = vmatpush1.bf16.msra.mxu0 %v1764_v16  ;;  %1793 = vmatprep.subr.bf16.mxu1 %v2012_v1  ;;  %v68_v34 = vld [vmem:[#allocation3 + $0xc8] sm:$0xff]  ;;  %v1797_v38 = vpack.c.bf16 %v60_v33, %v57_v32  ;;  %v63_v41 = vld [vmem:[#allocation3 + $0xa0] sm:$0xff]  ;;  %v66_v42 = vld [vmem:[#allocation3 + $0xb8] sm:$0xff]  ;;  %v1776_v45 = vpack.c.bf16 %v70_v40, %v67_v37 }
  0x1f   :  { %1767 = vmatprep.subr.bf16.mxu0 %v1766_v18  ;;  %v1774_v39 = vpack.c.bf16 %v71_v35, %v68_v34  ;;  %v74_v43 = vld [vmem:[#allocation3 + $0xf8] sm:$0xff]  ;;  %v77_v44 = vld [vmem:[#allocation3 + $0x110] sm:$0xff]  ;;  %v1800_v47 = vpack.c.bf16 %v66_v42, %v63_v41  ;;  %v76_v49 = vld [vmem:[#allocation3 + $0x108] sm:$0xff] }
  0x20   :  { %v73_v46 = vld [vmem:[#allocation3 + $0xf0] sm:$0xff]  ;;  %v1778_v48 = vpack.c.bf16 %v77_v44, %v74_v43  ;;  %v72_v51 = vld [vmem:[#allocation3 + $0xe8] sm:$0xff]  ;;  %v83_v53 = vld [vmem:[#allocation3 + $0x140] sm:$0xff] }
  0x21   :  { %1795 = vmatpush3.bf16.msra.mxu1 %v1794_v29  ;;  %v69_v50 = vld [vmem:[#allocation3 + $0xd0] sm:$0xff]  ;;  %v80_v52 = vld [vmem:[#allocation3 + $0x128] sm:$0xff]  ;;  %v1780_v54 = vpack.c.bf16 %v76_v49, %v73_v46  ;;  %v79_v55 = vld [vmem:[#allocation3 + $0x120] sm:$0xff] }
  0x22   :  { %1769 = vmatpush1.bf16.msra.mxu0 %v1768_v27  ;;  %1796 = vmatprep.subr.bf16.mxu1 %v2012_v1  ;;  %v1803_v56 = vpack.c.bf16 %v72_v51, %v69_v50  ;;  %v1782_v57 = vpack.c.bf16 %v83_v53, %v80_v52  ;;  %v82_v58 = vld [vmem:[#allocation3 + $0x138] sm:$0xff]  ;;  %v75_v59 = vld [vmem:[#allocation3 + $0x100] sm:$0xff]  ;;  %v89_v62 = vld [vmem:[#allocation3 + $0x170] sm:$0xff] }
  0x23   :  { %1771 = vmatprep.subr.bf16.mxu0 %v1770_v30  ;;  %v78_v60 = vld [vmem:[#allocation3 + $0x118] sm:$0xff]  ;;  %v1784_v63 = vpack.c.bf16 %v82_v58, %v79_v55  ;;  %v85_v0 = vld [vmem:[#allocation3 + $0x150] sm:$0xff]  ;;  %v88_v5 = vld [vmem:[#allocation3 + $0x168] sm:$0xff] }
  0x24   :  { %v86_v61 = vld [vmem:[#allocation3 + $0x158] sm:$0xff]  ;;  %v1806_v3 = vpack.c.bf16 %v78_v60, %v75_v59  ;;  %v81_v6 = vld [vmem:[#allocation3 + $0x130] sm:$0xff]  ;;  %v84_v7 = vld [vmem:[#allocation3 + $0x148] sm:$0xff]  ;;  %v1788_v8 = vpack.c.bf16 %v88_v5, %v85_v0 }
  0x25   :  { %1798 = vmatpush3.bf16.msra.mxu1 %v1797_v38  ;;  %v1786_v4 = vpack.c.bf16 %v89_v62, %v86_v61  ;;  %v1809_v9 = vpack.c.bf16 %v84_v7, %v81_v6  ;;  %v87_v10 = vld [vmem:[#allocation3 + $0x160] sm:$0xff]  ;;  %v90_v11 = vld [vmem:[#allocation3 + $0x178] sm:$0xff]  ;;  %v1471_v23 = vld [vmem:[%s2245_s2 + $0x10] sm:$0xff] }
  0x26   :  { %1773 = vmatpush1.bf16.msra.mxu0 %v1772_v36  ;;  %1799 = vmatprep.subr.bf16.mxu1 %v2012_v1  ;;  %v42_v12 = vld [vmem:[%s2243_s0] sm:$0xff]  ;;  %v1812_v13 = vpack.c.bf16 %v90_v11, %v87_v10  ;;  %v1473_v16 = vld [vmem:[%s2246_s3 + $0x8] sm:$0xff]  ;;  %v483_v29 = vld [vmem:[#allocation3 + $0x190] sm:$0xff] }
  0x27   :  { %1775 = vmatprep.subr.bf16.mxu0 %v1774_v39  ;;  %v232_v14 = vld [vmem:[%s2246_s3] sm:$0xff]  ;;  %v1469_v22 = vld [vmem:[%s2245_s2 + $0x8] sm:$0xff]  ;;  %v491_v34 = vld [vmem:[#allocation3 + $0x1d0] sm:$0xff] }
  0x28   :  { %310 = vperm.xlu0 %1971, %v232_v14   ;;  %v233_v17 = vld [vmem:[%s2245_s2] sm:$0xff]  ;;  %v482_v24 = vld [vmem:[#allocation3 + $0x188] sm:$0xff]  ;;  %v487_v36 = vld [vmem:[#allocation3 + $0x1b0] sm:$0xff] }
  0x29   :  { %1801 = vmatpush3.bf16.msra.mxu1 %v1800_v47  ;;  %v485_v25 = vld [vmem:[#allocation3 + $0x1a0] sm:$0xff]  ;;  %v484_v28 = vld [vmem:[#allocation3 + $0x198] sm:$0xff]  ;;  %v486_v31 = vld [vmem:[#allocation3 + $0x1a8] sm:$0xff] }
  0x2a   :  { %1777 = vmatpush1.bf16.msra.mxu0 %v1776_v45  ;;  %1802 = vmatprep.subr.bf16.mxu1 %v2012_v1  ;;  %v1814_v26 = vpack.c.bf16 %v485_v25, %v482_v24  ;;  %v481_v27 = vld [vmem:[#allocation3 + $0x180] sm:$0xff]  ;;  %v1847_v32 = vpack.c.bf16 %v486_v31, %v483_v29  ;;  %v488_v33 = vld [vmem:[#allocation3 + $0x1b8] sm:$0xff]  ;;  %v490_v37 = vld [vmem:[#allocation3 + $0x1c8] sm:$0xff] }
  0x2b   :  { %1779 = vmatprep.subr.bf16.mxu0 %v1778_v48  ;;  %v1816_v30 = vpack.c.bf16 %v484_v28, %v481_v27  ;;  %v1818_v35 = vpack.c.bf16 %v491_v34, %v488_v33  ;;  %v489_v38 = vld [vmem:[#allocation3 + $0x1c0] sm:$0xff]  ;;  %v1820_v39 = vpack.c.bf16 %v490_v37, %v487_v36  ;;  %v492_v40 = vld [vmem:[#allocation3 + $0x1d8] sm:$0xff]  ;;  %v494_v42 = vld [vmem:[#allocation3 + $0x1e8] sm:$0xff] }
  0x2c   :  { %749 = vperm.xlu0 %1971, %v1473_v16   ;;  %v1850_v41 = vpack.c.bf16 %v492_v40, %v489_v38  ;;  %v497_v43 = vld [vmem:[#allocation3 + $0x200] sm:$0xff]  ;;  %v496_v46 = vld [vmem:[#allocation3 + $0x1f8] sm:$0xff]  ;;  %v495_v47 = vld [vmem:[#allocation3 + $0x1f0] sm:$0xff] }
  0x2d   :  { %1804 = vmatpush3.bf16.msra.mxu1 %v1803_v56  ;;  %v493_v44 = vld [vmem:[#allocation3 + $0x1e0] sm:$0xff]  ;;  %v1822_v45 = vpack.c.bf16 %v497_v43, %v494_v42  ;;  %v498_v48 = vld [vmem:[#allocation3 + $0x208] sm:$0xff]  ;;  %v500_v51 = vld [vmem:[#allocation3 + $0x218] sm:$0xff] }
  0x2e   :  { %1781 = vmatpush1.bf16.msra.mxu0 %v1780_v54  ;;  %1805 = vmatprep.subr.bf16.mxu1 %v2012_v1  ;;  %v1824_v49 = vpack.c.bf16 %v496_v46, %v493_v44  ;;  %v1853_v50 = vpack.c.bf16 %v498_v48, %v495_v47  ;;  %v503_v52 = vld [vmem:[#allocation3 + $0x230] sm:$0xff]  ;;  %v502_v55 = vld [vmem:[#allocation3 + $0x228] sm:$0xff]  ;;  %v501_v56 = vld [vmem:[#allocation3 + $0x220] sm:$0xff] }
  0x2f   :  { %1783 = vmatprep.subr.bf16.mxu0 %v1782_v57  ;;  %v499_v53 = vld [vmem:[#allocation3 + $0x210] sm:$0xff]  ;;  %v1826_v54 = vpack.c.bf16 %v503_v52, %v500_v51  ;;  %v504_v57 = vld [vmem:[#allocation3 + $0x238] sm:$0xff]  ;;  %v506_v58 = vld [vmem:[#allocation3 + $0x248] sm:$0xff] }
  0x30   :  { %v509_v59 = vld [vmem:[#allocation3 + $0x260] sm:$0xff]  ;;  %v1828_v60 = vpack.c.bf16 %v502_v55, %v499_v53  ;;  %v1856_v61 = vpack.c.bf16 %v504_v57, %v501_v56  ;;  %v508_v0 = vld [vmem:[#allocation3 + $0x258] sm:$0xff]  ;;  %v515_v6 = vld [vmem:[#allocation3 + $0x290] sm:$0xff] }
  0x31   :  { %1807 = vmatpush3.bf16.msra.mxu1 %v1806_v3  ;;  %v1830_v62 = vpack.c.bf16 %v509_v59, %v506_v58  ;;  %v507_v3 = vld [vmem:[#allocation3 + $0x250] sm:$0xff]  ;;  %v512_v5 = vld [vmem:[#allocation3 + $0x278] sm:$0xff]  ;;  %v514_v11 = vld [vmem:[#allocation3 + $0x288] sm:$0xff] }
  0x32   :  { %1785 = vmatpush1.bf16.msra.mxu0 %v1784_v63  ;;  %1808 = vmatprep.subr.bf16.mxu1 %v2012_v1  ;;  %v505_v63 = vld [vmem:[#allocation3 + $0x240] sm:$0xff]  ;;  %v511_v10 = vld [vmem:[#allocation3 + $0x270] sm:$0xff]  ;;  %v518_v14 = vld [vmem:[#allocation3 + $0x2a8] sm:$0xff] }
  0x33   :  { %1787 = vmatprep.subr.bf16.mxu0 %v1786_v4  ;;  %v510_v4 = vld [vmem:[#allocation3 + $0x268] sm:$0xff]  ;;  %v1832_v7 = vpack.c.bf16 %v508_v0, %v505_v63  ;;  %v521_v15 = vld [vmem:[#allocation3 + $0x2c0] sm:$0xff]  ;;  %v1836_v16 = vpack.c.bf16 %v514_v11, %v511_v10  ;;  %v527_v24 = vld [vmem:[#allocation3 + $0x2f0] sm:$0xff] }
  0x34   :  { %v523_v28 = vld [vmem:[#allocation3 + $0x2d0] sm:$0xff]  ;;  %v526_v29 = vld [vmem:[#allocation3 + $0x2e8] sm:$0xff]  ;;  %v528_v31 = vld [vmem:[#allocation3 + $0x2f8] sm:$0xff] }
  0x35   :  { %1810 = vmatpush3.bf16.msra.mxu1 %v1809_v9  ;;  %v1834_v9 = vpack.c.bf16 %v515_v6, %v512_v5  ;;  %v1478_v55 = vld [vmem:[%s2245_s2 + $0x28] sm:$0xff]  ;;  %v1476_v56 = vld [vmem:[%s2245_s2 + $0x20] sm:$0xff]  ;;  %v930_v5 = vld [vmem:[#allocation3 + $0x350] sm:$0xff] }
  0x36   :  { %1789 = vmatpush1.bf16.msra.mxu0 %v1788_v8  ;;  %1811 = vmatprep.subr.bf16.mxu1 %v2012_v1  ;;  %v1859_v8 = vpack.c.bf16 %v510_v4, %v507_v3  ;;  %v921_v57 = vld [vmem:[#allocation3 + $0x308] sm:$0xff]  ;;  %v924_v58 = vld [vmem:[#allocation3 + $0x320] sm:$0xff]  ;;  %v927_v4 = vld [vmem:[#allocation3 + $0x338] sm:$0xff] }
  0x37   :  { %1608 = vmatprep.subr.mxu0 %v2013_v2  ;;  %v1870_v59 = vpack.c.bf16 %v924_v58, %v921_v57  ;;  %v925_v0 = vld [vmem:[#allocation3 + $0x328] sm:$0xff]  ;;  %v1874_v6 = vpack.c.bf16 %v930_v5, %v927_v4  ;;  %v931_v11 = vld [vmem:[#allocation3 + $0x358] sm:$0xff]  ;;  %v966_v57 = vld [vmem:[#allocation3 + $0x470] sm:$0xff] }
  0x39   :  { %156 = vmatmul.mubr.f32.vlgmr.msra.gmra.mrb[0].mxu0 %v42_v12  ;;  %1813 = vmatpush3.bf16.msra.mxu1 %v1812_v13  ;;  %v516_v13 = vld [vmem:[#allocation3 + $0x298] sm:$0xff] }
  0x3a   :  { %1610 = vmatprep.mubr.msk.f32.mxu0 %vm2014_vm0, %v2013_v2  ;;  %1815 = vmatprep.subr.bf16.mxu1 %v1814_v26 }
  0x3c   :  { %1606 = vmatmul.mubr.f32.vlgmr.msra.gmra.mrb[0].mxu1 %v42_v12  ;;  %v513_v12 = vld [vmem:[#allocation3 + $0x280] sm:$0xff] }
  0x3d   :  { %593 = vmatprep.mubr.f32.mxu1 %v2013_v2  ;;  %1817 = vmatpush1.bf16.msra.mxu1 %v1816_v30  ;;  %v525_v30 = vld [vmem:[#allocation3 + $0x2e0] sm:$0xff] }
  0x3e   :  { %1819 = vmatprep.subr.bf16.mxu1 %v1818_v35  ;;  %v1868_v33 = vpack.c.bf16 %v528_v31, %v525_v30  ;;  %v948_v30 = vld [vmem:[#allocation3 + $0x3e0] sm:$0xff] }
  0x41   :  { %1821 = vmatpush1.bf16.msra.mxu1 %v1820_v39 }
  0x42   :  { %1823 = vmatprep.subr.bf16.mxu1 %v1822_v45 }
  0x45   :  { %1825 = vmatpush1.bf16.msra.mxu1 %v1824_v49 }
  0x46   :  { %1827 = vmatprep.subr.bf16.mxu1 %v1826_v54 }
  0x49   :  { %1829 = vmatpush1.bf16.msra.mxu1 %v1828_v60  ;;  %v920_v60 = vld [vmem:[#allocation3 + $0x300] sm:$0xff] }
  0x4a   :  { %1831 = vmatprep.subr.bf16.mxu1 %v1830_v62  ;;  %v922_v62 = vld [vmem:[#allocation3 + $0x310] sm:$0xff] }
  0x4b   :  { %v1903_v3 = vpack.c.bf16 %v925_v0, %v922_v62  ;;  %v965_v62 = vld [vmem:[#allocation3 + $0x468] sm:$0xff]  ;;  %v967_v0 = vld [vmem:[#allocation3 + $0x478] sm:$0xff] }
  0x4d   :  { %1833 = vmatpush1.bf16.msra.mxu1 %v1832_v7  ;;  %v926_v7 = vld [vmem:[#allocation3 + $0x330] sm:$0xff] }
  0x4e   :  { %1835 = vmatprep.subr.bf16.mxu1 %v1834_v9  ;;  %v928_v9 = vld [vmem:[#allocation3 + $0x340] sm:$0xff] }
  0x51   :  { %1837 = vmatpush1.bf16.msra.mxu1 %v1836_v16 }
  0xa7   :  { %v311_v34 = vpop.permute.xlu0 %310 }
 0x10c   :  { %v157_v18 = vpop.f32.mrb[0].mxu0 }
 0x10d   :  { %v159_v19 = vpop.f32.mrb[1].mxu0  ;;  %1609 = vmatpush3.msra.mxu0 %v157_v18  ;;  %v1838_v18 = vpack.c.bf16 %v521_v15, %v518_v14  ;;  %v936_v14 = vld [vmem:[#allocation3 + $0x380] sm:$0xff] }
 0x10e   :  { %1611 = vmatmul.mubr.msk.f32.vlgmr.msra.gmra.mrb[2].mxu0 %vm234_vm1, %v233_v17  ;;  %1613 = vmatprep.subr.mxu0 %v2013_v2  ;;  %v1862_v17 = vpack.c.bf16 %v516_v13, %v513_v12  ;;  %v1906_v12 = vpack.c.bf16 %v931_v11, %v928_v9  ;;  %v933_v13 = vld [vmem:[#allocation3 + $0x368] sm:$0xff]  ;;  %v932_v15 = vld [vmem:[#allocation3 + $0x360] sm:$0xff] }
 0x10f   :  { %1614 = vmatpush3.msra.mxu0 %v159_v19  ;;  %1615 = vmatprep.mubr.msk.f32.mxu0 %vm2014_vm0, %v2013_v2  ;;  %v228_v20 = vpop.f32.mrb[0].mxu1  ;;  %v517_v19 = vld [vmem:[#allocation3 + $0x2a0] sm:$0xff]  ;;  %v1878_v16 = vpack.c.bf16 %v936_v14, %v933_v13 }
 0x110   :  { %1618 = vmatprep.subr.mxu0 %v2013_v2  ;;  %v1607_v21 = vpop.f32.mrb[1].mxu1  ;;  %1839 = vmatprep.subr.bf16.mxu1 %v1838_v18  ;;  %v934_v18 = vld [vmem:[#allocation3 + $0x370] sm:$0xff] }
 0x111   :  { %v519_v21 = vld [vmem:[#allocation3 + $0x2b0] sm:$0xff] }
 0x116   :  { %1616 = vmatmul.mubr.msk.f32.vlgmr.msra.gmra.mrb[2].mxu0 %vm234_vm1, %v1469_v22  ;;  %v522_v22 = vld [vmem:[#allocation3 + $0x2c8] sm:$0xff] }
 0x117   :  { %1619 = vmatpush3.msra.mxu0 %v228_v20  ;;  %1620 = vmatprep.mubr.msk.f32.mxu0 %vm2014_vm0, %v2013_v2  ;;  %v520_v20 = vld [vmem:[#allocation3 + $0x2b8] sm:$0xff]  ;;  %v1865_v26 = vpack.c.bf16 %v522_v22, %v519_v21 }
 0x118   :  { %1846 = vmatprep.subr.bf16.mxu0 %v2012_v1  ;;  %v1840_v25 = vpack.c.bf16 %v520_v20, %v517_v19  ;;  %v937_v19 = vld [vmem:[#allocation3 + $0x388] sm:$0xff]  ;;  %v939_v22 = vld [vmem:[#allocation3 + $0x398] sm:$0xff] }
 0x119   :  { %v1909_v21 = vpack.c.bf16 %v937_v19, %v934_v18 }
 0x11a   :  { %1841 = vmatpush1.bf16.msra.mxu1 %v1840_v25 }
 0x11e   :  { %1621 = vmatmul.mubr.msk.f32.vlgmr.msra.gmra.mrb[2].mxu0 %vm234_vm1, %v1471_v23  ;;  %v524_v23 = vld [vmem:[#allocation3 + $0x2d8] sm:$0xff] }
 0x11f   :  { %1655 = vmatprep.mubr.msk.f32.mxu0 %vm2014_vm0, %v2013_v2  ;;  %1848 = vmatpush3.bf16.msra.mxu0 %v1847_v32  ;;  %v1842_v27 = vpack.c.bf16 %v527_v24, %v524_v23  ;;  %v1844_v32 = vpack.c.bf16 %v526_v29, %v523_v28  ;;  %v942_v23 = vld [vmem:[#allocation3 + $0x3b0] sm:$0xff]  ;;  %v943_v28 = vld [vmem:[#allocation3 + $0x3b8] sm:$0xff]  ;;  %v945_v29 = vld [vmem:[#allocation3 + $0x3c8] sm:$0xff] }
 0x120   :  { %1849 = vmatprep.subr.bf16.mxu0 %v2012_v1  ;;  %v938_v24 = vld [vmem:[#allocation3 + $0x390] sm:$0xff]  ;;  %v1882_v25 = vpack.c.bf16 %v942_v23, %v939_v22 }
 0x121   :  { %1843 = vmatprep.subr.bf16.mxu1 %v1842_v27  ;;  %v940_v27 = vld [vmem:[#allocation3 + $0x3a0] sm:$0xff] }
 0x122   :  { %1845 = vmatpush1.bf16.msra.mxu1 %v1844_v32  ;;  %v1912_v32 = vpack.c.bf16 %v943_v28, %v940_v27 }
 0x123   :  { %1851 = vmatpush3.bf16.msra.mxu0 %v1850_v41  ;;  %1668 = vmatprep.subr.mxu1 %v2013_v2 }
 0x124   :  { %1852 = vmatprep.subr.bf16.mxu0 %v2012_v1 }
 0x127   :  { %1854 = vmatpush3.bf16.msra.mxu0 %v1853_v50  ;;  %v1474_v50 = vld [vmem:[%s2245_s2 + $0x18] sm:$0xff] }
 0x128   :  { %1855 = vmatprep.subr.bf16.mxu0 %v2012_v1 }
 0x12b   :  { %1857 = vmatpush3.bf16.msra.mxu0 %v1856_v61  ;;  %v923_v61 = vld [vmem:[#allocation3 + $0x318] sm:$0xff] }
 0x12c   :  { %1858 = vmatprep.subr.bf16.mxu0 %v2012_v1  ;;  %v1872_v63 = vpack.c.bf16 %v923_v61, %v920_v60  ;;  %v962_v61 = vld [vmem:[#allocation3 + $0x450] sm:$0xff] }
 0x12f   :  { %1860 = vmatpush3.bf16.msra.mxu0 %v1859_v8  ;;  %v929_v8 = vld [vmem:[#allocation3 + $0x348] sm:$0xff] }
 0x130   :  { %1861 = vmatprep.subr.bf16.mxu0 %v2012_v1  ;;  %v1876_v10 = vpack.c.bf16 %v929_v8, %v926_v7  ;;  %v750_v7 = vpop.permute.xlu0 %749 }
 0x133   :  { %1863 = vmatpush3.bf16.msra.mxu0 %v1862_v17  ;;  %v935_v17 = vld [vmem:[#allocation3 + $0x378] sm:$0xff] }
 0x134   :  { %1864 = vmatprep.subr.bf16.mxu0 %v2012_v1  ;;  %v1880_v20 = vpack.c.bf16 %v935_v17, %v932_v15 }
 0x137   :  { %1866 = vmatpush3.bf16.msra.mxu0 %v1865_v26  ;;  %v941_v26 = vld [vmem:[#allocation3 + $0x3a8] sm:$0xff] }
 0x138   :  { %1867 = vmatprep.subr.bf16.mxu0 %v2012_v1  ;;  %v1884_v31 = vpack.c.bf16 %v941_v26, %v938_v24  ;;  %v1480_v24 = vld [vmem:[%s2246_s3 + $0x10] sm:$0xff] }
 0x139   :  { %1188 = vperm.xlu1 %1972, %v1480_v24   ;;  %v1481_v26 = vld [vmem:[%s2245_s2 + $0x30] sm:$0xff] }
 0x13b   :  { %1869 = vmatpush3.bf16.msra.mxu0 %v1868_v33  ;;  %v1886_v33 = vpack.c.bf16 %v948_v30, %v945_v29 }
 0x13c   :  { %1658 = vmatprep.subr.mxu0 %v2013_v2 }
 0x1f1   :  { %v461_v35 = vpop.f32.mrb[2].mxu0 }
 0x1f2   :  { %v1950_v36 = vadd.f32 %v461_v35, %v311_v34  ;;  %v1622_v37 = vpop.f32.mrb[3].mxu0  ;;  %v944_v34 = vld [vmem:[#allocation3 + $0x3c0] sm:$0xff]  ;;  %v947_v35 = vld [vmem:[#allocation3 + $0x3d8] sm:$0xff] }
 0x1f3   :  { %v949_v37 = vld [vmem:[#allocation3 + $0x3e8] sm:$0xff] }
 0x1f4   :  { %v467_v38 = vmin.f32 %v1950_v36, 20.0  ;;  %vm466_vm3 = vcmp.gt.f32.partialorder %v1950_v36, 20.0 }
 0x1f6   :  { %v468_v39 = vmul.f32 1.442695, %v467_v38  ;;  %v951_v38 = vld [vmem:[#allocation3 + $0x3f8] sm:$0xff] }
 0x1f8   :  { %1973 = vpow2.f32 %v468_v39  ;;  %v954_v39 = vld [vmem:[#allocation3 + $0x410] sm:$0xff] }
 0x202   :  { %v1974_v40 = vpop.eup %1973 }
 0x203   :  { %v470_v41 = vadd.f32 1.0, %v1974_v40  ;;  %v473_v42 = vmul.f32 -0.5, %v1974_v40  ;;  %v476_v44 = vand.u32 2147483647, %v1974_v40 }
 0x205   :  { %1975 = vlog2.f32 %v470_v41  ;;  %v474_v43 = vadd.f32 1.0, %v473_v42  ;;  %vm477_vm2 = vcmp.lt.f32.partialorder %v476_v44, 0.0004427343  ;;  %v1890_v42 = vpack.c.bf16 %v954_v39, %v951_v38  ;;  %v953_v44 = vld [vmem:[#allocation3 + $0x408] sm:$0xff]  ;;  %v1370_v38 = vld [vmem:[%s2248_s5 + $0x20] sm:$0xff] }
 0x206   :  { %v1371_v39 = vld [vmem:[%s2248_s5 + $0x28] sm:$0xff] }
 0x207   :  { %v475_v47 = vmul.f32 %v1974_v40, %v474_v43  ;;  %v1888_v40 = vpack.c.bf16 %v947_v35, %v944_v34  ;;  %v950_v43 = vld [vmem:[#allocation3 + $0x3f0] sm:$0xff]  ;;  %v1367_v34 = vld [vmem:[%s2248_s5 + $0x8] sm:$0xff] }
 0x20f   :  { %v1976_v45 = vpop.eup %1975 }
 0x210   :  { %v472_v46 = vmul.f32 0.6931472, %v1976_v45  ;;  %v952_v45 = vld [vmem:[#allocation3 + $0x400] sm:$0xff] }
 0x212   :  { %v478_v48 = vsel %vm477_vm2, %v475_v47, %v472_v46  ;;  %v955_v46 = vld [vmem:[#allocation3 + $0x418] sm:$0xff]  ;;  %v957_v47 = vld [vmem:[#allocation3 + $0x428] sm:$0xff] }
 0x213   :  { %v479_v49 = vsel %vm466_vm3, %v1950_v36, %v478_v48  ;;  %v946_v36 = vld [vmem:[#allocation3 + $0x3d0] sm:$0xff]  ;;  %v960_v48 = vld [vmem:[#allocation3 + $0x440] sm:$0xff] }
 0x214   :  { %594 = vmatmul.mubr.f32.vlgmr.msra.gmra.mrb[2].mxu1 %v479_v49  ;;  %1656 = vmatmul.mubr.f32.vlgmr.msra.gmra.mrb[4].mxu0 %v479_v49  ;;  %v1915_v41 = vpack.c.bf16 %v949_v37, %v946_v36  ;;  %v1892_v49 = vpack.c.bf16 %v953_v44, %v950_v43  ;;  %v1369_v36 = vld [vmem:[%s2248_s5 + $0x18] sm:$0xff]  ;;  %v1374_v44 = vld [vmem:[%s2248_s5 + $0x40] sm:$0xff] }
 0x215   :  { %1660 = vmatprep.mubr.msk.f32.mxu0 %vm2014_vm0, %v2013_v2  ;;  %1670 = vmatprep.mubr.msk.f32.mxu1 %vm2014_vm0, %v2013_v2 }
 0x2e7   :  { %v595_v51 = vpop.f32.mrb[2].mxu1  ;;  %v666_v52 = vpop.f32.mrb[4].mxu0 }
 0x2e8   :  { %v597_v53 = vpop.f32.mrb[3].mxu1  ;;  %v1657_v54 = vpop.f32.mrb[5].mxu0  ;;  %1659 = vmatpush3.msra.mxu0 %v595_v51  ;;  %1669 = vmatpush3.msra.mxu1 %v666_v52  ;;  %v1894_v51 = vpack.c.bf16 %v960_v48, %v957_v47  ;;  %v956_v52 = vld [vmem:[#allocation3 + $0x420] sm:$0xff]  ;;  %v1376_v47 = vld [vmem:[%s2248_s5 + $0x50] sm:$0xff]  ;;  %v1377_v48 = vld [vmem:[%s2248_s5 + $0x58] sm:$0xff] }
 0x2e9   :  { %1661 = vmatmul.mubr.msk.f32.vlgmr.msra.gmra.mrb[6].mxu0 %vm234_vm1, %v1474_v50  ;;  %1663 = vmatprep.subr.mxu0 %v2013_v2  ;;  %v1918_v50 = vpack.c.bf16 %v955_v46, %v952_v45  ;;  %v958_v54 = vld [vmem:[#allocation3 + $0x430] sm:$0xff]  ;;  %v1375_v45 = vld [vmem:[%s2248_s5 + $0x48] sm:$0xff] }
 0x2ea   :  { %1664 = vmatpush3.msra.mxu0 %v597_v53  ;;  %1665 = vmatprep.mubr.msk.f32.mxu0 %vm2014_vm0, %v2013_v2  ;;  %v959_v53 = vld [vmem:[#allocation3 + $0x438] sm:$0xff]  ;;  %v1939_v46 = vpack.c.bf16 %v1375_v45, %v1374_v44 }
 0x2eb   :  { %1671 = vmatmul.mubr.msk.f32.vlgmr.msra.gmra.mrb[4].mxu1 %vm234_vm1, %v1478_v55  ;;  %1902 = vmatprep.subr.bf16.mxu1 %v2012_v1  ;;  %v961_v55 = vld [vmem:[#allocation3 + $0x448] sm:$0xff]  ;;  %v1896_v58 = vpack.c.bf16 %v959_v53, %v956_v52 }
 0x2ec   :  { %1705 = vmatprep.mubr.msk.f32.mxu1 %vm2014_vm0, %v2013_v2  ;;  %1871 = vmatprep.subr.bf16.mxu0 %v1870_v59  ;;  %v1921_v59 = vpack.c.bf16 %v961_v55, %v958_v54  ;;  %v1380_v53 = vld [vmem:[%s2248_s5 + $0x70] sm:$0xff]  ;;  %v1381_v54 = vld [vmem:[%s2248_s5 + $0x78] sm:$0xff] }
 0x2ed   :  { %1904 = vmatpush3.bf16.msra.mxu1 %v1903_v3  ;;  %v1900_v3 = vpack.c.bf16 %v965_v62, %v962_v61  ;;  %v1948_v55 = vpack.c.bf16 %v1381_v54, %v1380_v53 }
 0x2ee   :  { %1905 = vmatprep.subr.bf16.mxu1 %v2012_v1 }
 0x2f1   :  { %1666 = vmatmul.mubr.msk.f32.vlgmr.msra.gmra.mrb[6].mxu0 %vm234_vm1, %v1476_v56  ;;  %1907 = vmatpush3.bf16.msra.mxu1 %v1906_v12  ;;  %v963_v56 = vld [vmem:[#allocation3 + $0x458] sm:$0xff] }
 0x2f2   :  { %1032 = vmatprep.mubr.f32.mxu0 %v2013_v2  ;;  %1873 = vmatpush1.bf16.msra.mxu0 %v1872_v63  ;;  %v1898_v60 = vpack.c.bf16 %v966_v57, %v963_v56  ;;  %v964_v63 = vld [vmem:[#allocation3 + $0x460] sm:$0xff]  ;;  %v1189_v56 = vpop.permute.xlu1 %1188 }
 0x2f3   :  { %1875 = vmatprep.subr.bf16.mxu0 %v1874_v6  ;;  %1908 = vmatprep.subr.bf16.mxu1 %v2012_v1  ;;  %v1924_v4 = vpack.c.bf16 %v967_v0, %v964_v63 }
 0x2f5   :  { %1910 = vmatpush3.bf16.msra.mxu1 %v1909_v21 }
 0x2f6   :  { %1877 = vmatpush1.bf16.msra.mxu0 %v1876_v10  ;;  %1911 = vmatprep.subr.bf16.mxu1 %v2012_v1 }
 0x2f7   :  { %1879 = vmatprep.subr.bf16.mxu0 %v1878_v16 }
 0x2f9   :  { %1913 = vmatpush3.bf16.msra.mxu1 %v1912_v32  ;;  %v1485_v32 = vld [vmem:[%s2245_s2 + $0x40] sm:$0xff] }
 0x2fa   :  { %1881 = vmatpush1.bf16.msra.mxu0 %v1880_v20  ;;  %1914 = vmatprep.subr.bf16.mxu1 %v2012_v1 }
 0x2fb   :  { %1883 = vmatprep.subr.bf16.mxu0 %v1882_v25  ;;  %v1382_v25 = vld [vmem:[#allocation2] sm:$0x1] }
 0x2fc   :  { %1385 = vperm.xlu1 %1972, %v1382_v25  }
 0x2fd   :  { %1916 = vmatpush3.bf16.msra.mxu1 %v1915_v41  ;;  %v1372_v41 = vld [vmem:[%s2248_s5 + $0x30] sm:$0xff] }
 0x2fe   :  { %1885 = vmatpush1.bf16.msra.mxu0 %v1884_v31  ;;  %1917 = vmatprep.subr.bf16.mxu1 %v2012_v1  ;;  %v1483_v31 = vld [vmem:[%s2245_s2 + $0x38] sm:$0xff] }
 0x2ff   :  { %1887 = vmatprep.subr.bf16.mxu0 %v1886_v33  ;;  %v1366_v33 = vld [vmem:[%s2248_s5] sm:$0xff] }
 0x300   :  { %v1927_v35 = vpack.c.bf16 %v1367_v34, %v1366_v33 }
 0x301   :  { %1919 = vmatpush3.bf16.msra.mxu1 %v1918_v50  ;;  %v1378_v50 = vld [vmem:[%s2248_s5 + $0x60] sm:$0xff] }
 0x302   :  { %1889 = vmatpush1.bf16.msra.mxu0 %v1888_v40  ;;  %1920 = vmatprep.subr.bf16.mxu1 %v2012_v1  ;;  %v1933_v40 = vpack.c.bf16 %v1371_v39, %v1370_v38 }
 0x303   :  { %1891 = vmatprep.subr.bf16.mxu0 %v1890_v42  ;;  %v1373_v42 = vld [vmem:[%s2248_s5 + $0x38] sm:$0xff] }
 0x304   :  { %v1936_v43 = vpack.c.bf16 %v1373_v42, %v1372_v41 }
 0x305   :  { %1922 = vmatpush3.bf16.msra.mxu1 %v1921_v59 }
 0x306   :  { %1893 = vmatpush1.bf16.msra.mxu0 %v1892_v49  ;;  %1923 = vmatprep.subr.bf16.mxu1 %v2012_v1  ;;  %v1942_v49 = vpack.c.bf16 %v1377_v48, %v1376_v47 }
 0x307   :  { %1895 = vmatprep.subr.bf16.mxu0 %v1894_v51  ;;  %v1379_v51 = vld [vmem:[%s2248_s5 + $0x68] sm:$0xff] }
 0x308   :  { %v1945_v52 = vpack.c.bf16 %v1379_v51, %v1378_v50 }
 0x309   :  { %1925 = vmatpush3.bf16.msra.mxu1 %v1924_v4 }
 0x30a   :  { %1897 = vmatpush1.bf16.msra.mxu0 %v1896_v58  ;;  %1926 = vmatprep.subr.bf16.mxu1 %v2012_v1 }
 0x30b   :  { %1899 = vmatprep.subr.bf16.mxu0 %v1898_v60 }
 0x30e   :  { %1901 = vmatpush1.bf16.msra.mxu0 %v1900_v3 }
 0x30f   :  { %1708 = vmatprep.subr.mxu0 %v2013_v2 }
 0x3be   :  { %v900_v5 = vpop.f32.mrb[4].mxu1 }
 0x3bf   :  { %v1672_v6 = vpop.f32.mrb[5].mxu1 }
 0x3c4   :  { %v824_v8 = vpop.f32.mrb[6].mxu0 }
 0x3c5   :  { %v1951_v9 = vadd.f32 %v824_v8, %v750_v7  ;;  %v1667_v10 = vpop.f32.mrb[7].mxu0 }
 0x3c7   :  { %v1952_v11 = vadd.f32 %v1951_v9, %v900_v5 }
 0x3c9   :  { %v906_v12 = vmin.f32 %v1952_v11, 20.0  ;;  %vm905_vm5 = vcmp.gt.f32.partialorder %v1952_v11, 20.0 }
 0x3cb   :  { %v907_v13 = vmul.f32 1.442695, %v906_v12 }
 0x3cd   :  { %1977 = vpow2.f32 %v907_v13 }
 0x3d7   :  { %v1978_v14 = vpop.eup %1977 }
 0x3d8   :  { %v909_v15 = vadd.f32 1.0, %v1978_v14  ;;  %v912_v16 = vmul.f32 -0.5, %v1978_v14  ;;  %v915_v18 = vand.u32 2147483647, %v1978_v14 }
 0x3da   :  { %1979 = vlog2.f32 %v909_v15  ;;  %v913_v17 = vadd.f32 1.0, %v912_v16  ;;  %vm916_vm4 = vcmp.lt.f32.partialorder %v915_v18, 0.0004427343 }
 0x3dc   :  { %v914_v21 = vmul.f32 %v1978_v14, %v913_v17  ;;  %v1388_v17 = vlaneseq }
 0x3de   :  { %v1389_v18 = vshrl.u32 %v1388_v17, 7 }
 0x3e4   :  { %v1980_v19 = vpop.eup %1979 }
 0x3e5   :  { %v911_v20 = vmul.f32 0.6931472, %v1980_v19  ;;  %v1390_v19 = vsub.s32 0, %v1389_v18 }
 0x3e7   :  { %v917_v22 = vsel %vm916_vm4, %v914_v21, %v911_v20  ;;  %v1386_v20 = vpop.permute.xlu1 %1385 }
 0x3e8   :  { %v918_v23 = vsel %vm905_vm5, %v1952_v11, %v917_v22  ;;  %v1391_v21 = vrot.slane %v1386_v20, %v1390_v19 }
 0x3e9   :  { %1033 = vmatmul.mubr.f32.vlgmr.msra.gmra.mrb[8].mxu0 %v918_v23  ;;  %1706 = vmatmul.mubr.f32.vlgmr.msra.gmra.mrb[6].mxu1 %v918_v23 }
 0x3ea   :  { %1710 = vmatprep.mubr.msk.f32.mxu0 %vm2014_vm0, %v2013_v2  ;;  %1755 = vmatprep.mubr.msk.f32.mxu1 %vm2014_vm0, %v2013_v2 }
 0x3eb   :  { %1928 = vmatpush3.bf16.msra.mxu1 %v1927_v35 }
 0x3ec   :  { %1929 = vmatprep.subr.bf16.mxu1 %v2012_v1 }
 0x4bc   :  { %v1034_v27 = vpop.f32.mrb[8].mxu0  ;;  %v1105_v28 = vpop.f32.mrb[6].mxu1 }
 0x4bd   :  { %v1036_v29 = vpop.f32.mrb[9].mxu0  ;;  %v1707_v30 = vpop.f32.mrb[7].mxu1  ;;  %1709 = vmatpush3.msra.mxu0 %v1034_v27 }
 0x4be   :  { %1711 = vmatmul.mubr.msk.f32.vlgmr.msra.gmra.mrb[10].mxu0 %vm234_vm1, %v1481_v26  ;;  %1713 = vmatprep.subr.mxu0 %v2013_v2 }
 0x4bf   :  { %1714 = vmatpush3.msra.mxu0 %v1036_v29  ;;  %1715 = vmatprep.mubr.msk.f32.mxu0 %vm2014_vm0, %v2013_v2 }
 0x4c0   :  { %1718 = vmatprep.subr.mxu0 %v2013_v2 }
 0x4c6   :  { %1716 = vmatmul.mubr.msk.f32.vlgmr.msra.gmra.mrb[10].mxu0 %vm234_vm1, %v1483_v31 }
 0x4c7   :  { %1719 = vmatpush3.msra.mxu0 %v1105_v28  ;;  %1720 = vmatprep.mubr.msk.f32.mxu0 %vm2014_vm0, %v2013_v2  ;;  %v1368_v2 = vld [vmem:[%s2248_s5 + $0x10] sm:$0xff] }
 0x4c8   :  { %v1930_v37 = vpack.c.bf16 %v1369_v36, %v1368_v2 }
 0x4ca   :  { %1931 = vmatpush3.bf16.msra.mxu1 %v1930_v37 }
 0x4cb   :  { %1932 = vmatprep.subr.bf16.mxu1 %v2012_v1 }
 0x4ce   :  { %1721 = vmatmul.mubr.msk.f32.vlgmr.msra.gmra.mrb[10].mxu0 %vm234_vm1, %v1485_v32  ;;  %1934 = vmatpush3.bf16.msra.mxu1 %v1933_v40 }
 0x4cf   :  { %1935 = vmatprep.subr.bf16.mxu1 %v2012_v1 }
 0x4d2   :  { %1937 = vmatpush3.bf16.msra.mxu1 %v1936_v43 }
 0x4d3   :  { %1938 = vmatprep.subr.bf16.mxu1 %v2012_v1 }
 0x4d6   :  { %1940 = vmatpush3.bf16.msra.mxu1 %v1939_v46 }
 0x4d7   :  { %1941 = vmatprep.subr.bf16.mxu1 %v2012_v1 }
 0x4da   :  { %1943 = vmatpush3.bf16.msra.mxu1 %v1942_v49 }
 0x4db   :  { %1944 = vmatprep.subr.bf16.mxu1 %v2012_v1 }
 0x4de   :  { %1946 = vmatpush3.bf16.msra.mxu1 %v1945_v52 }
 0x4df   :  { %1947 = vmatprep.subr.bf16.mxu1 %v2012_v1  ;;  %v1358_v1 = vld [vmem:[%s2247_s4] sm:$0xff] }
 0x4e2   :  { %1949 = vmatpush3.bf16.msra.mxu1 %v1948_v55 }
 0x5a1   :  { %v1339_v57 = vpop.f32.mrb[10].mxu0 }
 0x5a2   :  { %v1953_v58 = vadd.f32 %v1339_v57, %v1189_v56  ;;  %v1722_v59 = vpop.f32.mrb[11].mxu0 }
 0x5a4   :  { %v1345_v60 = vmin.f32 %v1953_v58, 20.0  ;;  %vm1344_vm7 = vcmp.gt.f32.partialorder %v1953_v58, 20.0 }
 0x5a6   :  { %v1346_v61 = vmul.f32 1.442695, %v1345_v60 }
 0x5a8   :  { %1981 = vpow2.f32 %v1346_v61 }
 0x5b2   :  { %v1982_v62 = vpop.eup %1981 }
 0x5b3   :  { %v1348_v63 = vadd.f32 1.0, %v1982_v62  ;;  %v1351_v0 = vmul.f32 -0.5, %v1982_v62  ;;  %v1354_v4 = vand.u32 2147483647, %v1982_v62 }
 0x5b5   :  { %1983 = vlog2.f32 %v1348_v63  ;;  %v1352_v3 = vadd.f32 1.0, %v1351_v0  ;;  %vm1355_vm6 = vcmp.lt.f32.partialorder %v1354_v4, 0.0004427343 }
 0x5b7   :  { %v1353_v7 = vmul.f32 %v1982_v62, %v1352_v3 }
 0x5bf   :  { %v1984_v5 = vpop.eup %1983 }
 0x5c0   :  { %v1350_v6 = vmul.f32 0.6931472, %v1984_v5 }
 0x5c2   :  { %v1356_v8 = vsel %vm1355_vm6, %v1353_v7, %v1350_v6 }
 0x5c3   :  { %v1357_v9 = vsel %vm1344_vm7, %v1953_v58, %v1356_v8 }
 0x5c4   :  { %v1359_v10 = vmul.f32 %v1358_v1, %v1357_v9 }
 0x5c6   :  { %v1360_v11 = vrot.slane %v1359_v10, 4 }
 0x5c8   :  { %v1361_v12 = vadd.f32 %v1360_v11, %v1359_v10 }
 0x5ca   :  { %v1362_v13 = vrot.slane %v1361_v12, 2 }
 0x5cc   :  { %v1363_v14 = vadd.f32 %v1362_v13, %v1361_v12 }
 0x5ce   :  { %v1364_v15 = vrot.slane %v1363_v14, 1 }
 0x5d0   :  { %v1365_v16 = vadd.f32 %v1364_v15, %v1363_v14 }
 0x5d2   :  { %1756 = vmatmul.mubr.f32.vlgmr.msra.gmra.mrb[8].mxu1 %v1365_v16 }
 0x6a5   :  { %v1458_v22 = vpop.f32.mrb[8].mxu1 }
 0x6a6   :  { %v1459_v23 = vadd.f32 %v1458_v22, %v1391_v21  ;;  %v1757_v24 = vpop.f32.mrb[9].mxu1 }
 0x6a8   :  { %1462 = vst [vmem:[%s2250_s7] sm:$0x1] %v1459_v23 }
 0x6a9   :  { %1467 = vsyncpa [#allocation4], 1 }

</bundles_post_ra>
